<compile_context>
chip_gen: v6e
topology: v6e:2x2x1
jax: 0.10.0
libtpu: 0.0.40
codegen_flags: <defaults>
</compile_context>

<pallas_src>
import jax
import jax.numpy as jnp
from jax.experimental import pallas as pl
from jax.experimental.pallas import tpu as pltpu


def _gelu_tanh(x):
    # tanh-approximation GELU; the transcendental goes to the EUP slot on TPU.
    # TODO(synk): torch nn.GELU() default is the exact erf form; tanh form
    # deviates by <1e-3 and is covered by the test tolerance.
    c = jnp.float32(0.7978845608028654)  # sqrt(2/pi)
    return 0.5 * x * (1.0 + jnp.tanh(c * (x + 0.044715 * (x * x * x))))


# ----------------------------- Pallas kernel ------------------------------- #
def _moe_block_kernel(x_ref, w1_ref, b1_ref, w2_ref, b2_ref, gate_ref, out_ref,
                      acc_ref):
    # Grid: (expert_block g, batch tile b, Dh tile k) -- k innermost reduction.
    # x_ref:    (TB, Din_pad)       bf16   shared expert input
    # w1_ref:   (Din_pad, EPB*tk)   bf16   fused first-layer slice, (k, e, t) cols
    # b1_ref:   (1, EPB*tk)         f32
    # w2_ref:   (EPB, tk, Dout)     bf16
    # b2_ref:   (EPB, 1, Dout)      f32
    # gate_ref: (TB, EPB)           f32    lane-packed routing weights
    # out_ref:  (TB, EPB*Dout)      f32    this block's column slice of (B, 1024)
    # acc_ref:  (TB, EPB*Dout)      f32    VMEM scratch accumulator over Dh tiles
    k = pl.program_id(2)
    epb, tk, dout = w2_ref.shape

    @pl.when(k == 0)
    def _():
        acc_ref[...] = jnp.zeros_like(acc_ref)

    # Fused first GEMM over the EPB experts' Dh slice (f32 accumulation on MXU).
    h1 = jnp.dot(x_ref[...], w1_ref[...], preferred_element_type=jnp.float32)
    h1 = _gelu_tanh(h1 + b1_ref[...]).astype(jnp.bfloat16)

    # Block-diagonal second GEMM, statically unrolled over the EPB experts and
    # accumulated over the Dh tiles.
    for i in range(epb):
        acc_ref[:, i * dout:(i + 1) * dout] += jnp.dot(
            h1[:, i * tk:(i + 1) * tk], w2_ref[i],
            preferred_element_type=jnp.float32)

    @pl.when(k == pl.num_programs(2) - 1)
    def _():
        gate = gate_ref[...]                                        # (TB, EPB)
        for i in range(epb):
            out_ref[:, i * dout:(i + 1) * dout] = (
                gate[:, i:i + 1]
                * (acc_ref[:, i * dout:(i + 1) * dout] + b2_ref[i])
            ).astype(out_ref.dtype)
        # TODO(synk): on v5e consider a bf16 output dtype to halve writeback.


# ------------------------- weight prep (one-time) --------------------------- #
def _round_up(x, m):
    return -(-x // m) * m


def _pick_experts_per_block(E, Din_pad, Dh, Dout, budget_bytes=8 << 20):
    divisors = [d for d in range(1, E + 1) if E % d == 0]
    best = 1
    for d in divisors:                      # largest block whose fused W1 fits
        if Din_pad * d * Dh * 2 <= budget_bytes:
            best = d
    if best * Dout < 256:                   # keep the output block lane-dense
        for d in divisors:
            if d >= best and d * Dout >= 256:
                best = d
                break
    return best


def _pick_dh_block(Dh, Din_pad, EPB, budget_bytes=12 << 20):
    if Din_pad * EPB * Dh * 2 <= budget_bytes:
        return Dh                           # no Dh tiling needed
    best = Dh
    for tk in range(128, Dh, 128):          # largest lane-multiple divisor that fits
        if Dh % tk == 0 and Din_pad * EPB * tk * 2 <= budget_bytes:
            best = tk
    return best


def prepare_expert_params(params, *, experts_per_block=None, dh_block=None,
                          lane_multiple=128):
    """One-time weight repack (transpose, Din pad, bf16 cast) hoisted out of the
    forward so it is not re-executed per call."""
    w1, b1, w2, b2 = params["w1"], params["b1"], params["w2"], params["b2"]
    E, Din, Dh = w1.shape
    Dout = w2.shape[-1]
    Din_pad = _round_up(Din, lane_multiple)  # TODO(synk): use 256 on v6e/v7x

    EPB = experts_per_block or _pick_experts_per_block(E, Din_pad, Dh, Dout)
    assert E % EPB == 0, "num_experts must be divisible by experts_per_block"
    tk = dh_block or _pick_dh_block(Dh, Din_pad, EPB)
    assert Dh % tk == 0, "Dh must be divisible by dh_block"
    NK = Dh // tk

    # W1: (E, Din, Dh) -> zero-pad Din -> (Din_pad, E*Dh) with (k, expert, t)
    # column order so every (expert_block, dh_tile) block is one contiguous slab.
    w1p = jnp.pad(w1, ((0, 0), (0, Din_pad - Din), (0, 0)))
    w1p = jnp.transpose(w1p, (1, 0, 2)).reshape(Din_pad, E, NK, tk)
    w1p = jnp.transpose(w1p, (0, 2, 1, 3)).reshape(Din_pad, E * Dh)
    w1p = w1p.astype(jnp.bfloat16)
    b1p = jnp.transpose(b1.reshape(E, NK, tk), (1, 0, 2)).reshape(1, E * Dh)
    w2p = w2.astype(jnp.bfloat16)            # (E, Dh, Dout)
    b2p = b2.reshape(E, 1, Dout)             # f32
    # TODO(synk): v7x option -- fp8 weight quant (per-channel scales in epilogue).
    dims = dict(E=E, Din=Din, Din_pad=Din_pad, Dh=Dh, Dout=Dout,
                EPB=EPB, tk=tk, NK=NK)
    return dict(w1=w1p, b1=b1p, w2=w2p, b2=b2p, dims=dims)


# ------------------------------ kernel wrapper ------------------------------ #
def moe_experts_pallas(x, expert_weights, prepared, *, batch_block=None,
                       vmem_limit_bytes=64 << 20):
    """x:(B,Din) f32, expert_weights:(B,E) f32 -> full_output:(B, E*Dout) f32."""
    d = prepared["dims"]
    E, Din, Din_pad = d["E"], d["Din"], d["Din_pad"]
    Dout, EPB, tk, NK = d["Dout"], d["EPB"], d["tk"], d["NK"]
    NEB = E // EPB
    B = x.shape[0]

    # TODO(synk): tune per generation -- multiple of 128 (v5e) / 256 (v6e, v7x),
    # 512 on v7x once Dh-tiling keeps the f32 accumulator small.
    TB = batch_block if batch_block is not None else min(B, 512)
    assert B % TB == 0, "batch must be divisible by the batch tile"
    NB = B // TB

    xb = x.astype(jnp.bfloat16)
    if Din_pad != Din:                       # zero-pad K dim (numerically a no-op)
        xb = jnp.pad(xb, ((0, 0), (0, Din_pad - Din)))

    # Lane-packed routing weights: one (TB, EPB) tile per expert block.
    gate = jnp.transpose(expert_weights.reshape(B, NEB, EPB), (1, 0, 2))
    gate = gate.astype(jnp.float32)          # (NEB, B, EPB)

    return pl.pallas_call(
        _moe_block_kernel,
        out_shape=jax.ShapeDtypeStruct((B, E * Dout), jnp.float32),
        grid_spec=pltpu.PrefetchScalarGridSpec(
            num_scalar_prefetch=0,
            # Expert block outermost, batch tile next, Dh tile innermost.  With
            # NK == 1 (the default here) every weight block index is constant
            # across the inner batch axis, so Pallas keeps the weight blocks
            # VMEM-resident instead of re-streaming them per batch tile.
            grid=(NEB, NB, NK),
            in_specs=[
                pl.BlockSpec((TB, Din_pad), lambda g, b, k: (b, 0)),
                pl.BlockSpec((Din_pad, EPB * tk), lambda g, b, k: (0, k * NEB + g)),
                pl.BlockSpec((1, EPB * tk), lambda g, b, k: (0, k * NEB + g)),
                pl.BlockSpec((EPB, tk, Dout), lambda g, b, k: (g, k, 0)),
                pl.BlockSpec((EPB, 1, Dout), lambda g, b, k: (g, 0, 0)),
                pl.BlockSpec((pl.Squeezed(), TB, EPB), lambda g, b, k: (g, b, 0)),
            ],
            out_specs=pl.BlockSpec((TB, EPB * Dout), lambda g, b, k: (b, g)),
            scratch_shapes=[pltpu.VMEM((TB, EPB * Dout), jnp.float32)],
        ),
        # TODO(synk): on v7x, if xprof shows exposed W1 DMA after Dh-tiling, add
        # pipeline_mode=pl.Buffered(3) to the W1 spec (keep buffered bytes <48MiB).
        compiler_params=pltpu.CompilerParams(
            dimension_semantics=("parallel", "parallel", "arbitrary"),
            vmem_limit_bytes=vmem_limit_bytes,
        ),
    )(xb, prepared["w1"], prepared["b1"], prepared["w2"], prepared["b2"], gate)


# ------------------------------ JAX glue ----------------------------------- #
def _cosine_similarity(a, b, eps=1e-8):
    # a: (B, C), b: (E, C) -> (B, E)   (mirrors F.cosine_similarity semantics)
    num = a @ b.T
    denom = jnp.maximum(
        jnp.linalg.norm(a, axis=-1, keepdims=True) * jnp.linalg.norm(b, axis=-1)[None, :],
        eps,
    )
    return num / denom


def _gumbel_softmax(key, logits, tau):
    g = jax.random.gumbel(key, logits.shape, dtype=logits.dtype)
    return jax.nn.softmax((logits + g) / tau, axis=-1)


def sparse_codebook_moe_forward(params, prepared, h, code_emb, gumbel_key, *,
                                top_k=2, epoch=0):
    E = params["code_anchor"].shape[0]
    router_logits = _cosine_similarity(code_emb, params["code_anchor"]) * 0.125
    # TODO(synk): `epoch` is undefined in the PyTorch forward; fixed to epoch=0 here.
    tau = max(0.1, 0.5 * 0.95 ** epoch)
    expert_weights = _gumbel_softmax(gumbel_key, router_logits, tau)

    _, topk_idx = jax.lax.top_k(expert_weights, top_k)
    expert_mask = jnp.sum(jax.nn.one_hot(topk_idx, E, dtype=expert_weights.dtype), axis=1)
    expert_weights = expert_weights * expert_mask                    # (B, E)

    # TODO(synk): concat kept outside the kernel (tiny); could be split into two
    # in-kernel dots to avoid the extra HBM write at scale.
    expert_input = jnp.concatenate([h, code_emb], axis=-1)           # (B, hidden+code)

    full_output = moe_experts_pallas(expert_input, expert_weights, prepared)
    # TODO(synk): original asserts full_output.shape[-1] == 1024 // num_experts,
    # which is inconsistent with building a (B, 1024) tensor; skipped.

    # aux loss: torch calls Tensor.entropy() (does not exist); use -sum(p log p).
    expert_counts = expert_weights.sum(0)
    expert_load = expert_counts / expert_counts.sum()
    entropy = -jnp.sum(expert_load * jnp.log(jnp.maximum(expert_load, 1e-12)))
    aux_loss = 0.5 * (jnp.std(expert_counts, ddof=1) + entropy)
    return full_output, aux_loss


# ----------------------- deterministic parameter init ---------------------- #
def init_params(key, num_experts, hidden_dim, code_dim):
    Din, Dh, Dout = hidden_dim + code_dim, 4 * hidden_dim, 1024 // num_experts
    ks = jax.random.split(key, 6)
    code_anchor = jax.random.normal(ks[0], (num_experts, code_dim), jnp.float32)
    # W1 ~ Normal(mean=anchor[e,0], std=0.01)  (as in the torch __init__)
    w1 = code_anchor[:, 0][:, None, None] + 0.01 * jax.random.normal(
        ks[1], (num_experts, Din, Dh), jnp.float32
    )
    b1 = jax.random.uniform(
        ks[2], (num_experts, 1, Dh), jnp.float32, -1.0 / jnp.sqrt(Din), 1.0 / jnp.sqrt(Din)
    )
    # NOTE: torch zero-inits W2; small randoms here so the second matmul is exercised.
    w2 = 0.02 * jax.random.normal(ks[3], (num_experts, Dh, Dout), jnp.float32)
    b2 = jax.random.uniform(
        ks[4], (num_experts, 1, Dout), jnp.float32, -1.0 / jnp.sqrt(Dh), 1.0 / jnp.sqrt(Dh)
    )
    return {"code_anchor": code_anchor, "w1": w1, "b1": b1, "w2": w2, "b2": b2}


# ------------------------- pure-JAX reference path ------------------------- #
def _experts_reference(x, w1, b1, w2, b2, gate):
    # Mirrors the kernel numerics: bf16 MXU operands, f32 accumulation, tanh GELU.
    xb = x.astype(jnp.bfloat16)
    w1b = w1.astype(jnp.bfloat16)
    w2b = w2.astype(jnp.bfloat16)
    h1 = jnp.einsum("bd,edh->ebh", xb, w1b, preferred_element_type=jnp.float32) + b1
    h1 = _gelu_tanh(h1).astype(jnp.bfloat16)
    h2 = jnp.einsum("ebh,eho->ebo", h1, w2b, preferred_element_type=jnp.float32) + b2
    out = gate * h2                                                  # (E, B, Dout)
    return jnp.concatenate([out[e] for e in range(out.shape[0])], axis=-1)


# ---------------------------------- main ----------------------------------- #
if __name__ == "__main__":
    B, hidden_dim, code_dim, num_experts, top_k = 8, 32, 16, 4, 2

    root = jax.random.PRNGKey(0)
    k_param, k_h, k_code, k_gumbel = jax.random.split(root, 4)

    params = init_params(k_param, num_experts, hidden_dim, code_dim)
    prepared = prepare_expert_params(params)        # one-time repack, not per call
    h = jax.random.normal(k_h, (B, hidden_dim), jnp.float32)
    code_emb = jax.random.normal(k_code, (B, code_dim), jnp.float32)

    full_output, aux_loss = sparse_codebook_moe_forward(
        params, prepared, h, code_emb, k_gumbel, top_k=top_k
    )
    jax.block_until_ready((full_output, aux_loss))

    # cross-check the Pallas expert path against a pure-JAX reference
    router_logits = _cosine_similarity(code_emb, params["code_anchor"]) * 0.125
    ew = _gumbel_softmax(k_gumbel, router_logits, 0.5)
    _, idx = jax.lax.top_k(ew, top_k)
    ew = ew * jnp.sum(jax.nn.one_hot(idx, num_experts, dtype=ew.dtype), axis=1)
    ref = _experts_reference(
        jnp.concatenate([h, code_emb], axis=-1),
        params["w1"], params["b1"], params["w2"], params["b2"],
        jnp.transpose(ew)[:, :, None],
    )
    assert full_output.shape == (B, 1024)
    assert aux_loss.shape == ()
    assert jnp.allclose(full_output, ref, rtol=2e-2, atol=2e-2)

    print("KERNEL_OK")
</pallas_src>

<mosaic_0001>
module attributes {stable_mosaic.version = 11 : i64} {
  func.func @_moe_block_kernel(%arg0: i32, %arg1: i32, %arg2: i32, %arg3: memref<8x128xbf16, #tpu.memory_space<vmem>>, %arg4: memref<128x512xbf16, #tpu.memory_space<vmem>>, %arg5: memref<1x512xf32, #tpu.memory_space<vmem>>, %arg6: memref<4x128x256xbf16, #tpu.memory_space<vmem>>, %arg7: memref<4x1x256xf32, #tpu.memory_space<vmem>>, %arg8: memref<1x8x4xf32, #tpu.memory_space<vmem>>, %arg9: memref<8x1024xf32, #tpu.memory_space<vmem>>, %arg10: memref<8x1024xf32, #tpu.memory_space<vmem>>) attributes {dimension_semantics = [#tpu.dimension_semantics<parallel>, #tpu.dimension_semantics<parallel>, #tpu.dimension_semantics<arbitrary>], iteration_bounds = array<i64: 1, 1, 1>, scalar_prefetch = 0 : i64, scratch_operands = 1 : i64, tpu.core_type = #tpu.core_type<tc>, window_params = [{transform_indices = @transform_0, window_bounds = array<i64: 8, 128>}, {transform_indices = @transform_1, window_bounds = array<i64: 128, 512>}, {transform_indices = @transform_2, window_bounds = array<i64: 1, 512>}, {transform_indices = @transform_3, window_bounds = array<i64: 4, 128, 256>}, {transform_indices = @transform_4, window_bounds = array<i64: 4, 1, 256>}, {transform_indices = @transform_5, window_bounds = array<i64: 1, 8, 4>}, {transform_indices = @transform_6, window_bounds = array<i64: 8, 1024>}]} {
    %c0_i32 = arith.constant 0 : i32
    %0 = arith.cmpi eq, %arg2, %c0_i32 : i32
    %1 = arith.extui %0 : i1 to i32
    %c0_i32_0 = arith.constant 0 : i32
    %2 = arith.cmpi ne, %1, %c0_i32_0 : i32
    scf.if %2 {
      %cst_38 = arith.constant 0.000000e+00 : f32
      %54 = vector.broadcast %cst_38 : f32 to vector<8x1024xf32>
      %c0_39 = arith.constant 0 : index
      %c0_40 = arith.constant 0 : index
      %55 = vector.load %arg10[%c0_39, %c0_40] : memref<8x1024xf32, #tpu.memory_space<vmem>>, vector<8x1024xf32>
      tpu.vector_store %arg10[%c0_39, %c0_40], %54 {strides = array<i32>} : memref<8x1024xf32, #tpu.memory_space<vmem>>, vector<8x1024xf32>,
    } else {
    }
    %c0 = arith.constant 0 : index
    %c0_1 = arith.constant 0 : index
    %3 = vector.load %arg3[%c0, %c0_1] : memref<8x128xbf16, #tpu.memory_space<vmem>>, vector<8x128xbf16>
    %c0_2 = arith.constant 0 : index
    %c0_3 = arith.constant 0 : index
    %4 = vector.load %arg4[%c0_2, %c0_3] : memref<128x512xbf16, #tpu.memory_space<vmem>>, vector<128x512xbf16>
    %cst = arith.constant dense<0.000000e+00> : vector<8x512xf32>
    %5 = tpu.matmul %3, %4, %cst {dimension_numbers = #tpu.dot_dimension_numbers<[1], [0], [0], [1], [0, 0, 1, 1], [], []>} : vector<8x128xbf16>, vector<128x512xbf16>, vector<8x512xf32> -> vector<8x512xf32>
    %c0_4 = arith.constant 0 : index
    %c0_5 = arith.constant 0 : index
    %6 = vector.load %arg5[%c0_4, %c0_5] : memref<1x512xf32, #tpu.memory_space<vmem>>, vector<1x512xf32>
    %7 = vector.broadcast %6 : vector<1x512xf32> to vector<8x512xf32>
    %8 = arith.addf %5, %7 : vector<8x512xf32>
    %cst_6 = arith.constant 5.000000e-01 : f32
    %9 = vector.broadcast %cst_6 : f32 to vector<8x512xf32>
    %10 = arith.mulf %9, %8 : vector<8x512xf32>
    %11 = arith.mulf %8, %8 : vector<8x512xf32>
    %12 = arith.mulf %11, %8 : vector<8x512xf32>
    %cst_7 = arith.constant 4.471500e-02 : f32
    %13 = vector.broadcast %cst_7 : f32 to vector<8x512xf32>
    %14 = arith.mulf %13, %12 : vector<8x512xf32>
    %15 = arith.addf %8, %14 : vector<8x512xf32>
    %cst_8 = arith.constant 0.797884583 : f32
    %16 = vector.broadcast %cst_8 : f32 to vector<8x512xf32>
    %17 = arith.mulf %16, %15 : vector<8x512xf32>
    %18 = math.tanh %17 : vector<8x512xf32>
    %cst_9 = arith.constant 1.000000e+00 : f32
    %19 = vector.broadcast %cst_9 : f32 to vector<8x512xf32>
    %20 = arith.addf %19, %18 : vector<8x512xf32>
    %21 = arith.mulf %10, %20 : vector<8x512xf32>
    %22 = arith.truncf %21 : vector<8x512xf32> to vector<8x512xbf16>
    %c0_10 = arith.constant 0 : index
    %c0_11 = arith.constant 0 : index
    %23 = vector.load %arg10[%c0_10, %c0_11] : memref<8x1024xf32, #tpu.memory_space<vmem>>, vector<8x256xf32>
    %24 = vector.extract_strided_slice %22 {offsets = [0, 0], sizes = [8, 128], strides = [1, 1]} : vector<8x512xbf16> to vector<8x128xbf16>
    %c0_12 = arith.constant 0 : index
    %c0_13 = arith.constant 0 : index
    %c0_14 = arith.constant 0 : index
    %25 = vector.load %arg6[%c0_12, %c0_13, %c0_14] : memref<4x128x256xbf16, #tpu.memory_space<vmem>>, vector<1x128x256xbf16>
    %26 = vector.shape_cast %25 : vector<1x128x256xbf16> to vector<128x256xbf16>
    %cst_15 = arith.constant dense<0.000000e+00> : vector<8x256xf32>
    %27 = tpu.matmul %24, %26, %cst_15 {dimension_numbers = #tpu.dot_dimension_numbers<[1], [0], [0], [1], [0, 0, 1, 1], [], []>} : vector<8x128xbf16>, vector<128x256xbf16>, vector<8x256xf32> -> vector<8x256xf32>
    %28 = arith.addf %23, %27 : vector<8x256xf32>
    %c0_16 = arith.constant 0 : index
    %c0_17 = arith.constant 0 : index
    %29 = vector.load %arg10[%c0_16, %c0_17] : memref<8x1024xf32, #tpu.memory_space<vmem>>, vector<8x256xf32>
    tpu.vector_store %arg10[%c0_16, %c0_17], %28 {strides = array<i32>} : memref<8x1024xf32, #tpu.memory_space<vmem>>, vector<8x256xf32>,
    %c0_18 = arith.constant 0 : index
    %c256 = arith.constant 256 : index
    %30 = vector.load %arg10[%c0_18, %c256] : memref<8x1024xf32, #tpu.memory_space<vmem>>, vector<8x256xf32>
    %31 = vector.extract_strided_slice %22 {offsets = [0, 128], sizes = [8, 128], strides = [1, 1]} : vector<8x512xbf16> to vector<8x128xbf16>
    %c1 = arith.constant 1 : index
    %c0_19 = arith.constant 0 : index
    %c0_20 = arith.constant 0 : index
    %32 = vector.load %arg6[%c1, %c0_19, %c0_20] : memref<4x128x256xbf16, #tpu.memory_space<vmem>>, vector<1x128x256xbf16>
    %33 = vector.shape_cast %32 : vector<1x128x256xbf16> to vector<128x256xbf16>
    %cst_21 = arith.constant dense<0.000000e+00> : vector<8x256xf32>
    %34 = tpu.matmul %31, %33, %cst_21 {dimension_numbers = #tpu.dot_dimension_numbers<[1], [0], [0], [1], [0, 0, 1, 1], [], []>} : vector<8x128xbf16>, vector<128x256xbf16>, vector<8x256xf32> -> vector<8x256xf32>
    %35 = arith.addf %30, %34 : vector<8x256xf32>
    %c0_22 = arith.constant 0 : index
    %c256_23 = arith.constant 256 : index
    %36 = vector.load %arg10[%c0_22, %c256_23] : memref<8x1024xf32, #tpu.memory_space<vmem>>, vector<8x256xf32>
    tpu.vector_store %arg10[%c0_22, %c256_23], %35 {strides = array<i32>} : memref<8x1024xf32, #tpu.memory_space<vmem>>, vector<8x256xf32>,
    %c0_24 = arith.constant 0 : index
    %c512 = arith.constant 512 : index
    %37 = vector.load %arg10[%c0_24, %c512] : memref<8x1024xf32, #tpu.memory_space<vmem>>, vector<8x256xf32>
    %38 = vector.extract_strided_slice %22 {offsets = [0, 256], sizes = [8, 128], strides = [1, 1]} : vector<8x512xbf16> to vector<8x128xbf16>
    %c2 = arith.constant 2 : index
    %c0_25 = arith.constant 0 : index
    %c0_26 = arith.constant 0 : index
    %39 = vector.load %arg6[%c2, %c0_25, %c0_26] : memref<4x128x256xbf16, #tpu.memory_space<vmem>>, vector<1x128x256xbf16>
    %40 = vector.shape_cast %39 : vector<1x128x256xbf16> to vector<128x256xbf16>
    %cst_27 = arith.constant dense<0.000000e+00> : vector<8x256xf32>
    %41 = tpu.matmul %38, %40, %cst_27 {dimension_numbers = #tpu.dot_dimension_numbers<[1], [0], [0], [1], [0, 0, 1, 1], [], []>} : vector<8x128xbf16>, vector<128x256xbf16>, vector<8x256xf32> -> vector<8x256xf32>
    %42 = arith.addf %37, %41 : vector<8x256xf32>
    %c0_28 = arith.constant 0 : index
    %c512_29 = arith.constant 512 : index
    %43 = vector.load %arg10[%c0_28, %c512_29] : memref<8x1024xf32, #tpu.memory_space<vmem>>, vector<8x256xf32>
    tpu.vector_store %arg10[%c0_28, %c512_29], %42 {strides = array<i32>} : memref<8x1024xf32, #tpu.memory_space<vmem>>, vector<8x256xf32>,
    %c0_30 = arith.constant 0 : index
    %c768 = arith.constant 768 : index
    %44 = vector.load %arg10[%c0_30, %c768] : memref<8x1024xf32, #tpu.memory_space<vmem>>, vector<8x256xf32>
    %45 = vector.extract_strided_slice %22 {offsets = [0, 384], sizes = [8, 128], strides = [1, 1]} : vector<8x512xbf16> to vector<8x128xbf16>
    %c3 = arith.constant 3 : index
    %c0_31 = arith.constant 0 : index
    %c0_32 = arith.constant 0 : index
    %46 = vector.load %arg6[%c3, %c0_31, %c0_32] : memref<4x128x256xbf16, #tpu.memory_space<vmem>>, vector<1x128x256xbf16>
    %47 = vector.shape_cast %46 : vector<1x128x256xbf16> to vector<128x256xbf16>
    %cst_33 = arith.constant dense<0.000000e+00> : vector<8x256xf32>
    %48 = tpu.matmul %45, %47, %cst_33 {dimension_numbers = #tpu.dot_dimension_numbers<[1], [0], [0], [1], [0, 0, 1, 1], [], []>} : vector<8x128xbf16>, vector<128x256xbf16>, vector<8x256xf32> -> vector<8x256xf32>
    %49 = arith.addf %44, %48 : vector<8x256xf32>
    %c0_34 = arith.constant 0 : index
    %c768_35 = arith.constant 768 : index
    %50 = vector.load %arg10[%c0_34, %c768_35] : memref<8x1024xf32, #tpu.memory_space<vmem>>, vector<8x256xf32>
    tpu.vector_store %arg10[%c0_34, %c768_35], %49 {strides = array<i32>} : memref<8x1024xf32, #tpu.memory_space<vmem>>, vector<8x256xf32>,
    %c0_i32_36 = arith.constant 0 : i32
    %51 = arith.cmpi eq, %arg2, %c0_i32_36 : i32
    %52 = arith.extui %51 : i1 to i32
    %c0_i32_37 = arith.constant 0 : i32
    %53 = arith.cmpi ne, %52, %c0_i32_37 : i32
    scf.if %53 {
      %c0_38 = arith.constant 0 : index
      %c0_39 = arith.constant 0 : index
      %c0_40 = arith.constant 0 : index
      %54 = vector.load %arg8[%c0_38, %c0_39, %c0_40] : memref<1x8x4xf32, #tpu.memory_space<vmem>>, vector<1x8x4xf32>
      %55 = vector.shape_cast %54 : vector<1x8x4xf32> to vector<8x4xf32>
      %56 = vector.extract_strided_slice %55 {offsets = [0, 0], sizes = [8, 1], strides = [1, 1]} : vector<8x4xf32> to vector<8x1xf32>
      %c0_41 = arith.constant 0 : index
      %c0_42 = arith.constant 0 : index
      %57 = vector.load %arg10[%c0_41, %c0_42] : memref<8x1024xf32, #tpu.memory_space<vmem>>, vector<8x256xf32>
      %c0_43 = arith.constant 0 : index
      %c0_44 = arith.constant 0 : index
      %c0_45 = arith.constant 0 : index
      %58 = vector.load %arg7[%c0_43, %c0_44, %c0_45] : memref<4x1x256xf32, #tpu.memory_space<vmem>>, vector<1x1x256xf32>
      %59 = vector.shape_cast %58 : vector<1x1x256xf32> to vector<1x256xf32>
      %60 = vector.broadcast %59 : vector<1x256xf32> to vector<8x256xf32>
      %61 = arith.addf %57, %60 : vector<8x256xf32>
      %62 = vector.broadcast %56 : vector<8x1xf32> to vector<8x256xf32>
      %63 = arith.mulf %62, %61 : vector<8x256xf32>
      %c0_46 = arith.constant 0 : index
      %c0_47 = arith.constant 0 : index
      %64 = vector.load %arg9[%c0_46, %c0_47] : memref<8x1024xf32, #tpu.memory_space<vmem>>, vector<8x256xf32>
      tpu.vector_store %arg9[%c0_46, %c0_47], %63 {strides = array<i32>} : memref<8x1024xf32, #tpu.memory_space<vmem>>, vector<8x256xf32>,
      %65 = vector.extract_strided_slice %55 {offsets = [0, 1], sizes = [8, 1], strides = [1, 1]} : vector<8x4xf32> to vector<8x1xf32>
      %c0_48 = arith.constant 0 : index
      %c256_49 = arith.constant 256 : index
      %66 = vector.load %arg10[%c0_48, %c256_49] : memref<8x1024xf32, #tpu.memory_space<vmem>>, vector<8x256xf32>
      %c1_50 = arith.constant 1 : index
      %c0_51 = arith.constant 0 : index
      %c0_52 = arith.constant 0 : index
      %67 = vector.load %arg7[%c1_50, %c0_51, %c0_52] : memref<4x1x256xf32, #tpu.memory_space<vmem>>, vector<1x1x256xf32>
      %68 = vector.shape_cast %67 : vector<1x1x256xf32> to vector<1x256xf32>
      %69 = vector.broadcast %68 : vector<1x256xf32> to vector<8x256xf32>
      %70 = arith.addf %66, %69 : vector<8x256xf32>
      %71 = vector.broadcast %65 : vector<8x1xf32> to vector<8x256xf32>
      %72 = arith.mulf %71, %70 : vector<8x256xf32>
      %c0_53 = arith.constant 0 : index
      %c256_54 = arith.constant 256 : index
      %73 = vector.load %arg9[%c0_53, %c256_54] : memref<8x1024xf32, #tpu.memory_space<vmem>>, vector<8x256xf32>
      tpu.vector_store %arg9[%c0_53, %c256_54], %72 {strides = array<i32>} : memref<8x1024xf32, #tpu.memory_space<vmem>>, vector<8x256xf32>,
      %74 = vector.extract_strided_slice %55 {offsets = [0, 2], sizes = [8, 1], strides = [1, 1]} : vector<8x4xf32> to vector<8x1xf32>
      %c0_55 = arith.constant 0 : index
      %c512_56 = arith.constant 512 : index
      %75 = vector.load %arg10[%c0_55, %c512_56] : memref<8x1024xf32, #tpu.memory_space<vmem>>, vector<8x256xf32>
      %c2_57 = arith.constant 2 : index
      %c0_58 = arith.constant 0 : index
      %c0_59 = arith.constant 0 : index
      %76 = vector.load %arg7[%c2_57, %c0_58, %c0_59] : memref<4x1x256xf32, #tpu.memory_space<vmem>>, vector<1x1x256xf32>
      %77 = vector.shape_cast %76 : vector<1x1x256xf32> to vector<1x256xf32>
      %78 = vector.broadcast %77 : vector<1x256xf32> to vector<8x256xf32>
      %79 = arith.addf %75, %78 : vector<8x256xf32>
      %80 = vector.broadcast %74 : vector<8x1xf32> to vector<8x256xf32>
      %81 = arith.mulf %80, %79 : vector<8x256xf32>
      %c0_60 = arith.constant 0 : index
      %c512_61 = arith.constant 512 : index
      %82 = vector.load %arg9[%c0_60, %c512_61] : memref<8x1024xf32, #tpu.memory_space<vmem>>, vector<8x256xf32>
      tpu.vector_store %arg9[%c0_60, %c512_61], %81 {strides = array<i32>} : memref<8x1024xf32, #tpu.memory_space<vmem>>, vector<8x256xf32>,
      %83 = vector.extract_strided_slice %55 {offsets = [0, 3], sizes = [8, 1], strides = [1, 1]} : vector<8x4xf32> to vector<8x1xf32>
      %c0_62 = arith.constant 0 : index
      %c768_63 = arith.constant 768 : index
      %84 = vector.load %arg10[%c0_62, %c768_63] : memref<8x1024xf32, #tpu.memory_space<vmem>>, vector<8x256xf32>
      %c3_64 = arith.constant 3 : index
      %c0_65 = arith.constant 0 : index
      %c0_66 = arith.constant 0 : index
      %85 = vector.load %arg7[%c3_64, %c0_65, %c0_66] : memref<4x1x256xf32, #tpu.memory_space<vmem>>, vector<1x1x256xf32>
      %86 = vector.shape_cast %85 : vector<1x1x256xf32> to vector<1x256xf32>
      %87 = vector.broadcast %86 : vector<1x256xf32> to vector<8x256xf32>
      %88 = arith.addf %84, %87 : vector<8x256xf32>
      %89 = vector.broadcast %83 : vector<8x1xf32> to vector<8x256xf32>
      %90 = arith.mulf %89, %88 : vector<8x256xf32>
      %c0_67 = arith.constant 0 : index
      %c768_68 = arith.constant 768 : index
      %91 = vector.load %arg9[%c0_67, %c768_68] : memref<8x1024xf32, #tpu.memory_space<vmem>>, vector<8x256xf32>
      tpu.vector_store %arg9[%c0_67, %c768_68], %90 {strides = array<i32>} : memref<8x1024xf32, #tpu.memory_space<vmem>>, vector<8x256xf32>,
    } else {
    }
    return
  }
  func.func @transform_0(%arg0: i32, %arg1: i32, %arg2: i32) -> (i32, i32) {
    %c0_i32 = arith.constant 0 : i32
    %c0_i32_0 = arith.constant 0 : i32
    return %arg1, %c0_i32 : i32, i32
  }
  func.func @transform_1(%arg0: i32, %arg1: i32, %arg2: i32) -> (i32, i32) {
    %c1_i32 = arith.constant 1 : i32
    %0 = arith.muli %arg2, %c1_i32 : i32
    %1 = arith.addi %0, %arg0 : i32
    %c0_i32 = arith.constant 0 : i32
    %c0_i32_0 = arith.constant 0 : i32
    return %c0_i32, %1 : i32, i32
  }
  func.func @transform_2(%arg0: i32, %arg1: i32, %arg2: i32) -> (i32, i32) {
    %c1_i32 = arith.constant 1 : i32
    %0 = arith.muli %arg2, %c1_i32 : i32
    %1 = arith.addi %0, %arg0 : i32
    %c0_i32 = arith.constant 0 : i32
    %c0_i32_0 = arith.constant 0 : i32
    return %c0_i32, %1 : i32, i32
  }
  func.func @transform_3(%arg0: i32, %arg1: i32, %arg2: i32) -> (i32, i32, i32) {
    %c0_i32 = arith.constant 0 : i32
    %c0_i32_0 = arith.constant 0 : i32
    return %arg0, %arg2, %c0_i32 : i32, i32, i32
  }
  func.func @transform_4(%arg0: i32, %arg1: i32, %arg2: i32) -> (i32, i32, i32) {
    %c0_i32 = arith.constant 0 : i32
    %c0_i32_0 = arith.constant 0 : i32
    %c0_i32_1 = arith.constant 0 : i32
    return %arg0, %c0_i32, %c0_i32_0 : i32, i32, i32
  }
  func.func @transform_5(%arg0: i32, %arg1: i32, %arg2: i32) -> (i32, i32, i32) {
    %c0_i32 = arith.constant 0 : i32
    %c0_i32_0 = arith.constant 0 : i32
    return %arg0, %arg1, %c0_i32 : i32, i32, i32
  }
  func.func @transform_6(%arg0: i32, %arg1: i32, %arg2: i32) -> (i32, i32) {
    %c0_i32 = arith.constant 0 : i32
    return %arg1, %arg0 : i32, i32
  }
}

</mosaic_0001>

<bundles_post_ra>
// kernel: tpu_custom_call.1
= control target key start
LH: loop header
LB: loop body
LE: loop exit
PB: predicated region body
PF: predicated region fallthrough
CT: control target
= control target key end

     0   :  { %11 = vsyncpa [#allocation4], 0  ;;  %s1586_s0 = inlined_call_operand.vmem [shape: bf16[8,128], index: 0, kind: input, shape index: {}]   ;;  %s1587_s1 = inlined_call_operand.hbm [shape: bf16[128,512], index: 1, kind: input, shape index: {}]   ;;  %s1588_s2 = inlined_call_operand.hbm [shape: f32[1,512], index: 2, kind: input, shape index: {}]   ;;  %s1589_s3 = inlined_call_operand.hbm [shape: bf16[4,128,256], index: 3, kind: input, shape index: {}]   ;;  %s1590_s4 = inlined_call_operand.vmem [shape: f32[4,1,256], index: 4, kind: input, shape index: {}]   ;;  %s1591_s5 = inlined_call_operand.vmem [shape: f32[1,8,4], index: 5, kind: input, shape index: {}]   ;;  %s1592_s6 = inlined_call_operand.hbm [shape: f32[8,1024], index: 6, kind: output, shape index: {}]  }
   0x1   :  { %12 = vsyncpa [#allocation7], 0 }
   0x2   :  { %13 = vsyncpa [#allocation5], 0  ;;  %s1474_s21 = smov [#allocation6]   ;;  %s1475_s23 = smov [#allocation3]  }
   0x3   :  { %s42_s22 = sshll.u32 %s1474_s21, 4  ;;  %s25_s24 = sshll.u32 %s1475_s23, 4  ;;  %s43_s22 = int_to_ptr.vmem [resolvable:$true] %s42_s22  ;;  %s26_s24 = int_to_ptr.vmem [resolvable:$true] %s25_s24 }
   0x4   :  { %s1396_s25 = scalar_lea.vmem %s43_s22, 64  ;;  %p1401_p1 = scmp.lt.s32.totalorder %s43_s22, %s43_s22 }
   0x5   :  { %p1397_p0 = scmp.ne.s32.totalorder %s43_s22, %s1396_s25  ;;  %p1402_p2 = scmp.lt.s32.totalorder %s1396_s25, %s1396_s25 }
   0x7   :  { %p1403_p3 = por %p1402_p2, %p1401_p1 }
   0x9   :  { %p1404_p4 = pnand %p1403_p3, %p1397_p0 }
   0xb   :  { %1407 = shalt.err (!%p1404_p4)
}
   0xc   :  { %45 = dma.hbm_to_vmem [thread:$0]  %s1588_s2, 64, %s43_s22, [#allocation7]  }
   0xd   :  { %s1416_s28 = scalar_lea.vmem %s26_s24, 4096  ;;  %p1421_p6 = scmp.lt.s32.totalorder %s26_s24, %s26_s24 }
   0xe   :  { %p1417_p5 = scmp.ne.s32.totalorder %s26_s24, %s1416_s28  ;;  %p1422_p7 = scmp.lt.s32.totalorder %s1416_s28, %s1416_s28 }
  0x10   :  { %p1423_p8 = por %p1422_p7, %p1421_p6 }
  0x12   :  { %p1424_p9 = pnand %p1423_p8, %p1417_p5 }
  0x14   :  { %1427 = shalt.err (!%p1424_p9)
}
  0x15   :  { %s1476_s29 = smov 256   ;;  %s1477_s30 = smov 16  }
  0x16   :  { %31 = dma.hbm_to_vmem [thread:$0]  %s1587_s1, 4096, %s26_s24, [#allocation4], %s1476_s29, %s1476_s29, %s1477_s30  }
  0x17   :  { %s1478_s9 = smov [#allocation8]  }
  0x18   :  { %s51_s10 = sshll.u32 %s1478_s9, 4  ;;  %s52_s10 = int_to_ptr.vmem [resolvable:$true] %s51_s10 }
  0x19   :  { %s1436_s11 = scalar_lea.vmem %s52_s10, 8192  ;;  %p1441_p11 = scmp.lt.s32.totalorder %s52_s10, %s52_s10 }
  0x1a   :  { %p1437_p10 = scmp.ne.s32.totalorder %s52_s10, %s1436_s11  ;;  %p1442_p12 = scmp.lt.s32.totalorder %s1436_s11, %s1436_s11 }
  0x1c   :  { %p1443_p13 = por %p1442_p12, %p1441_p11 }
  0x1e   :  { %p1444_p0 = pnand %p1443_p13, %p1437_p10 }
  0x20   :  { %1447 = shalt.err (!%p1444_p0)
}
  0x21   :  { %s1479_s2 = smov 128   ;;  %s1480_s12 = smov 8  }
  0x22   :  { %57 = dma.hbm_to_vmem [thread:$0]  %s1589_s3, 8192, %s52_s10, [#allocation7], %s1479_s2, %s1479_s2, %s1480_s12  }
  0x23   :  { %1468 = dma.done.wait [#allocation4], 4096  }
  0x24   :  { %1469 = vsyncadd [#allocation4], 4294963200 }
  0x25   :  { %1470 = dma.done.wait [#allocation7], 8256  }
  0x26   :  { %1471 = vsyncadd [#allocation7], 4294959040  ;;  %v1481_v0 = vmov 0   ;;  %v1236_v1 = vld [vmem:[#allocation3 + $0xe4] ss:$16 sps:$4 sm:$0xff]   ;;  %s1485_s23 = smov [#allocation9]  }
  0x27   :  { %335 = vmatprep.mubr.bf16.mxu0 %v1481_v0  ;;  %376 = vmatprep.mubr.bf16.mxu1 %v1481_v0  ;;  %v1238_v2 = vld [vmem:[#allocation3 + $0xe0] ss:$16 sps:$4 sm:$0xff]   ;;  %v1239_v3 = vld [vmem:[#allocation3 + $0xc4] ss:$16 sps:$4 sm:$0xff]   ;;  %v1242_v5 = vld [vmem:[#allocation3 + $0xec] ss:$16 sps:$4 sm:$0xff]  }
  0x28   :  { %1231 = vset.pattern.permute.xlu0 %v1481_v0  ;;  %303 = vmatprep.subr.bf16.mxu0 %v1236_v1  ;;  %v1241_v4 = vld [vmem:[#allocation3 + $0xc0] ss:$16 sps:$4 sm:$0xff]   ;;  %v1244_v6 = vld [vmem:[#allocation3 + $0xe8] ss:$16 sps:$4 sm:$0xff]   ;;  %v1245_v7 = vld [vmem:[#allocation3 + $0xa4] ss:$16 sps:$4 sm:$0xff]  }
  0x29   :  { %304 = vmatpush1.bf16.msra.mxu0 %v1238_v2  ;;  %344 = vmatprep.subr.bf16.mxu1 %v1242_v5  ;;  %v1248_v8 = vld [vmem:[#allocation3 + $0xcc] ss:$16 sps:$4 sm:$0xff]   ;;  %v1250_v9 = vld [vmem:[#allocation3 + $0xc8] ss:$16 sps:$4 sm:$0xff]   ;;  %v1247_v10 = vld [vmem:[#allocation3 + $0xa0] ss:$16 sps:$4 sm:$0xff]  }
  0x2a   :  { %305 = vmatprep.subr.bf16.mxu0 %v1239_v3  ;;  %345 = vmatpush1.bf16.msra.mxu1 %v1244_v6  ;;  %v1251_v11 = vld [vmem:[#allocation3 + $0x84] ss:$16 sps:$4 sm:$0xff]   ;;  %v1254_v12 = vld [vmem:[#allocation3 + $0xac] ss:$16 sps:$4 sm:$0xff]   ;;  %v1256_v13 = vld [vmem:[#allocation3 + $0xa8] ss:$16 sps:$4 sm:$0xff]  }
  0x2b   :  { %346 = vmatprep.subr.bf16.mxu1 %v1248_v8  ;;  %v1253_v14 = vld [vmem:[#allocation3 + $0x80] ss:$16 sps:$4 sm:$0xff]   ;;  %v1260_v15 = vld [vmem:[#allocation3 + $0x8c] ss:$16 sps:$4 sm:$0xff]   ;;  %v1257_v16 = vld [vmem:[#allocation3 + $0x64] ss:$16 sps:$4 sm:$0xff]  }
  0x2c   :  { %v1262_v17 = vld [vmem:[#allocation3 + $0x88] ss:$16 sps:$4 sm:$0xff]   ;;  %v1259_v18 = vld [vmem:[#allocation3 + $0x60] ss:$16 sps:$4 sm:$0xff]   ;;  %v1266_v19 = vld [vmem:[#allocation3 + $0x6c] ss:$16 sps:$4 sm:$0xff]  }
  0x2d   :  { %306 = vmatpush1.bf16.msra.mxu0 %v1241_v4  ;;  %v1263_v20 = vld [vmem:[#allocation3 + $0x44] ss:$16 sps:$4 sm:$0xff]   ;;  %v1268_v21 = vld [vmem:[#allocation3 + $0x68] ss:$16 sps:$4 sm:$0xff]   ;;  %v1265_v22 = vld [vmem:[#allocation3 + $0x40] ss:$16 sps:$4 sm:$0xff]  }
  0x2e   :  { %307 = vmatprep.subr.bf16.mxu0 %v1245_v7  ;;  %347 = vmatpush1.bf16.msra.mxu1 %v1250_v9  ;;  %v1272_v23 = vld [vmem:[#allocation3 + $0x4c] ss:$16 sps:$4 sm:$0xff]   ;;  %v1269_v24 = vld [vmem:[#allocation3 + $0x24] ss:$16 sps:$4 sm:$0xff]   ;;  %v1271_v25 = vld [vmem:[#allocation3 + $0x20] ss:$16 sps:$4 sm:$0xff]   ;;  %v123_v9 = vlaneseq }
  0x2f   :  { %348 = vmatprep.subr.bf16.mxu1 %v1254_v12  ;;  %v1274_v26 = vld [vmem:[#allocation3 + $0x48] ss:$16 sps:$4 sm:$0xff]   ;;  %v1278_v27 = vld [vmem:[#allocation3 + $0x2c] ss:$16 sps:$4 sm:$0xff]   ;;  %v1275_v28 = vld [vmem:[#allocation3 + $0x4] ss:$16 sps:$4 sm:$0xff]  }
  0x30   :  { %v1280_v29 = vld [vmem:[#allocation3 + $0x28] ss:$16 sps:$4 sm:$0xff]   ;;  %v1277_v30 = vld [vmem:[#allocation3] ss:$16 sps:$4 sm:$0xff]   ;;  %v1281_v31 = vld [vmem:[#allocation3 + $0xc] ss:$16 sps:$4 sm:$0xff]  }
  0x31   :  { %308 = vmatpush1.bf16.msra.mxu0 %v1247_v10  ;;  %v1283_v32 = vld [vmem:[#allocation3 + $0x8] ss:$16 sps:$4 sm:$0xff]   ;;  %v88_v33 = vld [vmem:[%s1586_s0] sm:$0xf]  ;;  %v1284_v35 = vld [vmem:[#allocation8 + $0x70] ss:$8 sps:$4 sm:$0xff]  }
  0x32   :  { %309 = vmatprep.subr.bf16.mxu0 %v1251_v11  ;;  %349 = vmatpush1.bf16.msra.mxu1 %v1256_v13  ;;  %v1286_v34 = vld [vmem:[#allocation8 + $0x74] ss:$8 sps:$4 sm:$0xff]   ;;  %v1287_v37 = vld [vmem:[#allocation8 + $0xf0] ss:$8 sps:$4 sm:$0xff]   ;;  %v1292_v38 = vld [vmem:[#allocation8 + $0x64] ss:$8 sps:$4 sm:$0xff]  }
  0x33   :  { %350 = vmatprep.subr.bf16.mxu1 %v1260_v15  ;;  %v1289_v36 = vld [vmem:[#allocation8 + $0xf4] ss:$8 sps:$4 sm:$0xff]   ;;  %v1290_v39 = vld [vmem:[#allocation8 + $0x60] ss:$8 sps:$4 sm:$0xff]   ;;  %v1295_v40 = vld [vmem:[#allocation8 + $0xe4] ss:$8 sps:$4 sm:$0xff]  }
  0x34   :  { %v1293_v41 = vld [vmem:[#allocation8 + $0xe0] ss:$8 sps:$4 sm:$0xff]   ;;  %v1298_v42 = vld [vmem:[#allocation8 + $0x54] ss:$8 sps:$4 sm:$0xff]   ;;  %v1296_v43 = vld [vmem:[#allocation8 + $0x50] ss:$8 sps:$4 sm:$0xff]  }
  0x35   :  { %310 = vmatpush1.bf16.msra.mxu0 %v1253_v14  ;;  %v1301_v44 = vld [vmem:[#allocation8 + $0xd4] ss:$8 sps:$4 sm:$0xff]   ;;  %v1299_v45 = vld [vmem:[#allocation8 + $0xd0] ss:$8 sps:$4 sm:$0xff]   ;;  %v1304_v46 = vld [vmem:[#allocation8 + $0x44] ss:$8 sps:$4 sm:$0xff]  }
  0x36   :  { %311 = vmatprep.subr.bf16.mxu0 %v1257_v16  ;;  %351 = vmatpush1.bf16.msra.mxu1 %v1262_v17  ;;  %v1302_v47 = vld [vmem:[#allocation8 + $0x40] ss:$8 sps:$4 sm:$0xff]   ;;  %v1307_v48 = vld [vmem:[#allocation8 + $0xc4] ss:$8 sps:$4 sm:$0xff]   ;;  %v1310_v50 = vld [vmem:[#allocation8 + $0x34] ss:$8 sps:$4 sm:$0xff]  }
  0x37   :  { %352 = vmatprep.subr.bf16.mxu1 %v1266_v19  ;;  %v1305_v49 = vld [vmem:[#allocation8 + $0xc0] ss:$8 sps:$4 sm:$0xff]   ;;  %v1308_v51 = vld [vmem:[#allocation8 + $0x30] ss:$8 sps:$4 sm:$0xff]   ;;  %v1313_v52 = vld [vmem:[#allocation8 + $0xb4] ss:$8 sps:$4 sm:$0xff]  }
  0x38   :  { %v1311_v53 = vld [vmem:[#allocation8 + $0xb0] ss:$8 sps:$4 sm:$0xff]   ;;  %v1314_v54 = vld [vmem:[#allocation8 + $0x20] ss:$8 sps:$4 sm:$0xff]   ;;  %v1316_v55 = vld [vmem:[#allocation8 + $0x24] ss:$8 sps:$4 sm:$0xff]  }
  0x39   :  { %312 = vmatpush1.bf16.msra.mxu0 %v1259_v18  ;;  %v1317_v56 = vld [vmem:[#allocation8 + $0xa0] ss:$8 sps:$4 sm:$0xff]   ;;  %v1319_v57 = vld [vmem:[#allocation8 + $0xa4] ss:$8 sps:$4 sm:$0xff]   ;;  %v1322_v58 = vld [vmem:[#allocation8 + $0x14] ss:$8 sps:$4 sm:$0xff]  }
  0x3a   :  { %313 = vmatprep.subr.bf16.mxu0 %v1263_v20  ;;  %353 = vmatpush1.bf16.msra.mxu1 %v1268_v21  ;;  %v1325_v59 = vld [vmem:[#allocation8 + $0x94] ss:$8 sps:$4 sm:$0xff]   ;;  %v1320_v60 = vld [vmem:[#allocation8 + $0x10] ss:$8 sps:$4 sm:$0xff]   ;;  %v1328_v61 = vld [vmem:[#allocation8 + $0x4] ss:$8 sps:$4 sm:$0xff]  }
  0x3b   :  { %354 = vmatprep.subr.bf16.mxu1 %v1272_v23  ;;  %v1323_v62 = vld [vmem:[#allocation8 + $0x90] ss:$8 sps:$4 sm:$0xff]   ;;  %v1331_v63 = vld [vmem:[#allocation8 + $0x84] ss:$8 sps:$4 sm:$0xff]   ;;  %v1326_v1 = vld [vmem:[#allocation8] ss:$8 sps:$4 sm:$0xff]  }
  0x3c   :  { %v1334_v2 = vld [vmem:[#allocation8 + $0x174] ss:$8 sps:$4 sm:$0xff]   ;;  %v1329_v3 = vld [vmem:[#allocation8 + $0x80] ss:$8 sps:$4 sm:$0xff]   ;;  %v1482_v6 = vmov 2   ;;  %v1483_v7 = vmov 1  }
  0x3d   :  { %314 = vmatpush1.bf16.msra.mxu0 %v1265_v22  ;;  %v1337_v4 = vld [vmem:[#allocation8 + $0x1f4] ss:$8 sps:$4 sm:$0xff]   ;;  %1233 = vset.pattern.permute.xlu1 %v1482_v6  ;;  %v1484_v8 = vmov 3   ;;  %v124_v10 = vshrl.u32 %v123_v9, 7  ;;  %v1347_v9 = vld [vmem:[#allocation8 + $0x1d0] ss:$8 sps:$4 sm:$0xff]  }
  0x3e   :  { %315 = vmatprep.subr.bf16.mxu0 %v1269_v24  ;;  %355 = vmatpush1.bf16.msra.mxu1 %v1274_v26  ;;  %v1003_v5 = vld [vmem:[%s1591_s5] sm:$0xff] }
  0x3f   :  { %356 = vmatprep.subr.bf16.mxu1 %v1278_v27  ;;  %1022 = vperm.xlu0 %1231, %v1003_v5   ;;  %v1541_v11 = vsub.s32 0, %v124_v10  ;;  %v121_v12 = vld [vmem:[#allocation6] sm:$0xf]  ;;  %v1543_v13 = vsub.s32 1, %v124_v10 }
  0x40   :  { %1072 = vperm.xlu1 %1233, %v1003_v5   ;;  %v1349_v6 = vld [vmem:[#allocation8 + $0x1d4] ss:$8 sps:$4 sm:$0xff]  }
  0x41   :  { %316 = vmatpush1.bf16.msra.mxu0 %v1271_v25  ;;  %v126_v14 = vrot.slane %v121_v12, %v1541_v11  ;;  %v130_v15 = vrot.slane %v121_v12, %v1543_v13 }
  0x42   :  { %317 = vmatprep.subr.bf16.mxu0 %v1275_v28  ;;  %357 = vmatpush1.bf16.msra.mxu1 %v1280_v29  ;;  %v133_v29 = vsub.s32 2, %v124_v10 }
  0x43   :  { %358 = vmatprep.subr.bf16.mxu1 %v1281_v31  ;;  %1232 = vset.pattern.permute.xlu0 %v1483_v7  ;;  %v1344_v7 = vld [vmem:[#allocation8 + $0x150] ss:$8 sps:$4 sm:$0xff]  }
  0x44   :  { %1047 = vperm.xlu0 %1232, %v1003_v5   ;;  %1234 = vset.pattern.permute.xlu1 %v1484_v8 }
  0x45   :  { %318 = vmatpush1.bf16.msra.mxu0 %v1277_v30  ;;  %1097 = vperm.xlu1 %1234, %v1003_v5  }
  0x46   :  { %359 = vmatpush1.bf16.msra.mxu1 %v1283_v32  ;;  %523 = vmatprep.subr.bf16.mxu0 %v1286_v34 }
  0x47   :  { %667 = vmatprep.subr.bf16.mxu1 %v1289_v36 }
  0x48   :  { %336 = vmatmul.mubr.bf16.vlgmr.msra.gmra.mxu0 %v88_v33  ;;  %1235 = vset.pattern.permute.xlu0 %v1484_v8  ;;  %v1352_v8 = vld [vmem:[#allocation8 + $0x144] ss:$8 sps:$4 sm:$0xff]  }
  0x49   :  { %555 = vmatprep.mubr.bf16.mxu0 %v1481_v0  ;;  %377 = vmatmul.mubr.bf16.vlgmr.msra.gmra.mxu1 %v88_v33  ;;  %v137_v33 = vsub.s32 3, %v124_v10  ;;  %v1355_v10 = vld [vmem:[#allocation8 + $0x1c4] ss:$8 sps:$4 sm:$0xff]  }
  0x4a   :  { %699 = vmatprep.mubr.bf16.mxu1 %v1481_v0  ;;  %524 = vmatpush1.bf16.msra.mxu0 %v1284_v35 }
  0x4b   :  { %668 = vmatpush1.bf16.msra.mxu1 %v1287_v37  ;;  %525 = vmatprep.subr.bf16.mxu0 %v1292_v38  ;;  %v134_v37 = vrot.slane %v121_v12, %v133_v29 }
  0x4c   :  { %669 = vmatprep.subr.bf16.mxu1 %v1295_v40 }
  0x4e   :  { %526 = vmatpush1.bf16.msra.mxu0 %v1290_v39  ;;  %v138_v39 = vrot.slane %v121_v12, %v137_v33  ;;  %v1350_v12 = vld [vmem:[#allocation8 + $0x140] ss:$8 sps:$4 sm:$0xff]  }
  0x4f   :  { %670 = vmatpush1.bf16.msra.mxu1 %v1293_v41  ;;  %527 = vmatprep.subr.bf16.mxu0 %v1298_v42 }
  0x50   :  { %671 = vmatprep.subr.bf16.mxu1 %v1301_v44 }
  0x52   :  { %528 = vmatpush1.bf16.msra.mxu0 %v1296_v43 }
  0x53   :  { %672 = vmatpush1.bf16.msra.mxu1 %v1299_v45  ;;  %529 = vmatprep.subr.bf16.mxu0 %v1304_v46 }
  0x54   :  { %673 = vmatprep.subr.bf16.mxu1 %v1307_v48 }
  0x56   :  { %530 = vmatpush1.bf16.msra.mxu0 %v1302_v47 }
  0x57   :  { %674 = vmatpush1.bf16.msra.mxu1 %v1305_v49  ;;  %531 = vmatprep.subr.bf16.mxu0 %v1310_v50 }
  0x58   :  { %675 = vmatprep.subr.bf16.mxu1 %v1313_v52 }
  0x5a   :  { %532 = vmatpush1.bf16.msra.mxu0 %v1308_v51 }
  0x5b   :  { %676 = vmatpush1.bf16.msra.mxu1 %v1311_v53  ;;  %533 = vmatprep.subr.bf16.mxu0 %v1316_v55  ;;  %v1332_v55 = vld [vmem:[#allocation8 + $0x170] ss:$8 sps:$4 sm:$0xff]  }
  0x5c   :  { %677 = vmatprep.subr.bf16.mxu1 %v1319_v57 }
  0x5e   :  { %534 = vmatpush1.bf16.msra.mxu0 %v1314_v54 }
  0x5f   :  { %535 = vmatprep.subr.bf16.mxu0 %v1322_v58  ;;  %678 = vmatpush1.bf16.msra.mxu1 %v1317_v56 }
  0x60   :  { %679 = vmatprep.subr.bf16.mxu1 %v1325_v59  ;;  %v1340_v59 = vld [vmem:[#allocation8 + $0x164] ss:$8 sps:$4 sm:$0xff]  }
  0x62   :  { %536 = vmatpush1.bf16.msra.mxu0 %v1320_v60  ;;  %v1335_v60 = vld [vmem:[#allocation8 + $0x1f0] ss:$8 sps:$4 sm:$0xff]  }
  0x63   :  { %537 = vmatprep.subr.bf16.mxu0 %v1328_v61  ;;  %680 = vmatpush1.bf16.msra.mxu1 %v1323_v62 }
  0x64   :  { %681 = vmatprep.subr.bf16.mxu1 %v1331_v63  ;;  %v1343_v63 = vld [vmem:[#allocation8 + $0x1e4] ss:$8 sps:$4 sm:$0xff]  }
  0x66   :  { %538 = vmatpush1.bf16.msra.mxu0 %v1326_v1  ;;  %v1338_v1 = vld [vmem:[#allocation8 + $0x160] ss:$8 sps:$4 sm:$0xff]  }
  0x67   :  { %811 = vmatprep.subr.bf16.mxu0 %v1334_v2  ;;  %682 = vmatpush1.bf16.msra.mxu1 %v1329_v3  ;;  %v1346_v3 = vld [vmem:[#allocation8 + $0x154] ss:$8 sps:$4 sm:$0xff]  }
  0x68   :  { %955 = vmatprep.subr.bf16.mxu1 %v1337_v4  ;;  %v1341_v4 = vld [vmem:[#allocation8 + $0x1e0] ss:$8 sps:$4 sm:$0xff]  }
 0x108   :  { %v337_v16 = vpop.f32.mrf.mxu0 }
 0x109   :  { %v338_v17 = vadd.f32 %v337_v16, %v126_v14  ;;  %v378_v21 = vpop.f32.mrf.mxu1  ;;  %v1358_v14 = vld [vmem:[#allocation8 + $0x134] ss:$8 sps:$4 sm:$0xff]   ;;  %v1356_v16 = vld [vmem:[#allocation8 + $0x130] ss:$8 sps:$4 sm:$0xff]  }
 0x10a   :  { %v339_v18 = vpop.f32.mrf.mxu0  ;;  %v1547_v40 = vadd.f32 %v378_v21, %v134_v37  ;;  %v1370_v21 = vld [vmem:[#allocation8 + $0x114] ss:$8 sps:$4 sm:$0xff]  }
 0x10b   :  { %v389_v19 = vmul.f32 %v338_v17, %v338_v17  ;;  %v340_v20 = vadd.f32 %v339_v18, %v130_v15  ;;  %v380_v25 = vpop.f32.mrf.mxu1  ;;  %v385_v47 = vmul.f32 0.5, %v338_v17  ;;  %v1353_v15 = vld [vmem:[#allocation8 + $0x1c0] ss:$8 sps:$4 sm:$0xff]   ;;  %v1359_v18 = vld [vmem:[#allocation8 + $0x1b0] ss:$8 sps:$4 sm:$0xff]  }
 0x10c   :  { %v341_v22 = vpop.f32.mrf.mxu0  ;;  %v1549_v41 = vadd.f32 %v380_v25, %v138_v39  ;;  %v391_v42 = vmul.f32 %v1547_v40, %v1547_v40 }
 0x10d   :  { %v393_v23 = vmul.f32 %v389_v19, %v338_v17  ;;  %v390_v24 = vmul.f32 %v340_v20, %v340_v20  ;;  %v382_v30 = vpop.f32.mrf.mxu1  ;;  %v386_v51 = vmul.f32 0.5, %v340_v20  ;;  %v1367_v19 = vld [vmem:[#allocation8 + $0x1a4] ss:$8 sps:$4 sm:$0xff]  }
 0x10e   :  { %v342_v26 = vpop.f32.mrf.mxu0  ;;  %v392_v43 = vmul.f32 %v1549_v41, %v1549_v41  ;;  %v395_v44 = vmul.f32 %v391_v42, %v1547_v40  ;;  %v1371_v30 = vld [vmem:[#allocation8 + $0x190] ss:$8 sps:$4 sm:$0xff]   ;;  %v1216_v42 = vld [vmem:[%s1590_s4 + $0x2] sm:$0x3] }
 0x10f   :  { %v397_v27 = vmul.f32 0.044715, %v393_v23  ;;  %v394_v28 = vmul.f32 %v390_v24, %v340_v20  ;;  %v383_v34 = vpop.f32.mrf.mxu1  ;;  %v1365_v23 = vld [vmem:[#allocation8 + $0x1a0] ss:$8 sps:$4 sm:$0xff]   ;;  %v1373_v24 = vld [vmem:[#allocation8 + $0x194] ss:$8 sps:$4 sm:$0xff]  }
 0x110   :  { %v396_v45 = vmul.f32 %v392_v43, %v1549_v41  ;;  %v399_v48 = vmul.f32 0.044715, %v395_v44  ;;  %v1368_v26 = vld [vmem:[#allocation8 + $0x110] ss:$8 sps:$4 sm:$0xff]   ;;  %v1374_v34 = vld [vmem:[#allocation8 + $0x100] ss:$8 sps:$4 sm:$0xff]  }
 0x111   :  { %v401_v31 = vadd.f32 %v397_v27, %v338_v17  ;;  %v398_v32 = vmul.f32 0.044715, %v394_v28  ;;  %v1364_v17 = vld [vmem:[#allocation8 + $0x124] ss:$8 sps:$4 sm:$0xff]   ;;  %v387_v27 = vmul.f32 0.5, %v1547_v40 }
 0x112   :  { %v400_v52 = vmul.f32 0.044715, %v396_v45  ;;  %v403_v56 = vadd.f32 %v399_v48, %v1547_v40  ;;  %v1376_v28 = vld [vmem:[#allocation8 + $0x104] ss:$8 sps:$4 sm:$0xff]   ;;  %v1006_v40 = vld [vmem:[%s1590_s4] sm:$0x3]  ;;  %v1037_v45 = vrot.slane %v1216_v42, %v1541_v11 }
 0x113   :  { %v405_v35 = vmul.f32 0.7978846, %v401_v31  ;;  %v402_v36 = vadd.f32 %v398_v32, %v340_v20  ;;  %v1362_v20 = vld [vmem:[#allocation8 + $0x120] ss:$8 sps:$4 sm:$0xff]   ;;  %v388_v31 = vmul.f32 0.5, %v1549_v41  ;;  %v1011_v43 = vrot.slane %v1006_v40, %v1541_v11 }
 0x114   :  { %v404_v61 = vadd.f32 %v400_v52, %v1549_v41  ;;  %v407_v2 = vmul.f32 0.7978846, %v403_v56  ;;  %v1379_v32 = vld [vmem:[#allocation8 + $0x184] ss:$8 sps:$4 sm:$0xff]   ;;  %v1023_v41 = vpop.permute.xlu0 %1022  ;;  %v1015_v44 = vrot.slane %v1006_v40, %v1543_v13 }
 0x115   :  { %1380 = vtanh.f32 %v405_v35  ;;  %v406_v38 = vmul.f32 0.7978846, %v402_v36  ;;  %v1377_v36 = vld [vmem:[#allocation8 + $0x180] ss:$8 sps:$4 sm:$0xff]  }
 0x116   :  { %v408_v5 = vmul.f32 0.7978846, %v404_v61 }
 0x117   :  { %1382 = vtanh.f32 %v406_v38 }
 0x118   :  { %1384 = vtanh.f32 %v407_v2  ;;  %v1048_v48 = vpop.permute.xlu0 %1047  ;;  %v1073_v2 = vpop.permute.xlu1 %1072 }
 0x119   :  { %1386 = vtanh.f32 %v408_v5 }
 0x122   :  { %v1381_v46 = vpop.eup %1380 }
 0x123   :  { %v413_v49 = vadd.f32 1.0, %v1381_v46 }
 0x124   :  { %v1383_v50 = vpop.eup %1382 }
 0x125   :  { %v417_v53 = vmul.f32 %v413_v49, %v385_v47  ;;  %v414_v54 = vadd.f32 1.0, %v1383_v50  ;;  %v1385_v22 = vpop.eup %1384  ;;  %v1041_v49 = vrot.slane %v1216_v42, %v1543_v13 }
 0x126   :  { %v1387_v25 = vpop.eup %1386  ;;  %v415_v29 = vadd.f32 1.0, %v1385_v22 }
 0x127   :  { %v421_v57 = vpack.c.bf16 %v417_v53, %v417_v53  ;;  %v418_v58 = vmul.f32 %v414_v54, %v386_v51  ;;  %v416_v33 = vadd.f32 1.0, %v1387_v25 }
 0x128   :  { %v419_v35 = vmul.f32 %v415_v29, %v387_v27 }
 0x129   :  { %556 = vmatmul.mubr.bf16.vlgmr.msra.gmra.mxu0 %v421_v57  ;;  %v422_v62 = vpack.c.bf16 %v418_v58, %v418_v58  ;;  %v420_v37 = vmul.f32 %v416_v33, %v388_v31 }
 0x12a   :  { %812 = vmatpush1.bf16.msra.mxu0 %v1332_v55  ;;  %843 = vmatprep.mubr.bf16.mxu0 %v1481_v0  ;;  %v423_v38 = vpack.c.bf16 %v419_v35, %v419_v35 }
 0x12b   :  { %700 = vmatmul.mubr.bf16.vlgmr.msra.gmra.mxu1 %v422_v62  ;;  %813 = vmatprep.subr.bf16.mxu0 %v1340_v59  ;;  %v424_v39 = vpack.c.bf16 %v420_v37, %v420_v37 }
 0x12c   :  { %956 = vmatpush1.bf16.msra.mxu1 %v1335_v60  ;;  %987 = vmatprep.mubr.bf16.mxu1 %v1481_v0  ;;  %v1361_v0 = vld [vmem:[#allocation8 + $0x1b4] ss:$8 sps:$4 sm:$0xff]  }
 0x12d   :  { %957 = vmatprep.subr.bf16.mxu1 %v1343_v63 }
 0x12e   :  { %814 = vmatpush1.bf16.msra.mxu0 %v1338_v1  ;;  %v1217_v1 = vld [vmem:[%s1590_s4 + $0x4] sm:$0x3] }
 0x12f   :  { %815 = vmatprep.subr.bf16.mxu0 %v1346_v3  ;;  %v1218_v3 = vld [vmem:[%s1590_s4 + $0x6] sm:$0x3]  ;;  %v1066_v5 = vrot.slane %v1217_v1, %v1543_v13  ;;  %s1110_s4 = sshll.u32 %s1485_s23, 4  ;;  %s1111_s4 = int_to_ptr.vmem [resolvable:$true] %s1110_s4 }
 0x130   :  { %958 = vmatpush1.bf16.msra.mxu1 %v1341_v4  ;;  %v1062_v4 = vrot.slane %v1217_v1, %v1541_v11  ;;  %s1448_s24 = scalar_lea.vmem %s1111_s4, 1024  ;;  %p1453_p2 = scmp.lt.s32.totalorder %s1111_s4, %s1111_s4 }
 0x131   :  { %959 = vmatprep.subr.bf16.mxu1 %v1349_v6  ;;  %v1087_v6 = vrot.slane %v1218_v3, %v1541_v11  ;;  %p1449_p1 = scmp.ne.s32.totalorder %s1111_s4, %s1448_s24  ;;  %p1454_p3 = scmp.lt.s32.totalorder %s1448_s24, %s1448_s24 }
 0x132   :  { %816 = vmatpush1.bf16.msra.mxu0 %v1344_v7 }
 0x133   :  { %817 = vmatprep.subr.bf16.mxu0 %v1352_v8  ;;  %p1455_p4 = por %p1454_p3, %p1453_p2 }
 0x134   :  { %960 = vmatpush1.bf16.msra.mxu1 %v1347_v9  ;;  %v1098_v9 = vpop.permute.xlu1 %1097 }
 0x135   :  { %961 = vmatprep.subr.bf16.mxu1 %v1355_v10  ;;  %v1091_v10 = vrot.slane %v1218_v3, %v1543_v13  ;;  %p1456_p5 = pnand %p1455_p4, %p1449_p1 }
 0x136   :  { %818 = vmatpush1.bf16.msra.mxu0 %v1350_v12 }
 0x137   :  { %819 = vmatprep.subr.bf16.mxu0 %v1358_v14 }
 0x138   :  { %962 = vmatpush1.bf16.msra.mxu1 %v1353_v15 }
 0x139   :  { %963 = vmatprep.subr.bf16.mxu1 %v1361_v0 }
 0x13a   :  { %820 = vmatpush1.bf16.msra.mxu0 %v1356_v16 }
 0x13b   :  { %821 = vmatprep.subr.bf16.mxu0 %v1364_v17 }
 0x13c   :  { %964 = vmatpush1.bf16.msra.mxu1 %v1359_v18 }
 0x13d   :  { %965 = vmatprep.subr.bf16.mxu1 %v1367_v19 }
 0x13e   :  { %822 = vmatpush1.bf16.msra.mxu0 %v1362_v20 }
 0x13f   :  { %823 = vmatprep.subr.bf16.mxu0 %v1370_v21 }
 0x140   :  { %966 = vmatpush1.bf16.msra.mxu1 %v1365_v23 }
 0x141   :  { %967 = vmatprep.subr.bf16.mxu1 %v1373_v24 }
 0x142   :  { %824 = vmatpush1.bf16.msra.mxu0 %v1368_v26 }
 0x143   :  { %825 = vmatprep.subr.bf16.mxu0 %v1376_v28 }
 0x144   :  { %968 = vmatpush1.bf16.msra.mxu1 %v1371_v30 }
 0x145   :  { %969 = vmatprep.subr.bf16.mxu1 %v1379_v32 }
 0x146   :  { %826 = vmatpush1.bf16.msra.mxu0 %v1374_v34 }
 0x148   :  { %970 = vmatpush1.bf16.msra.mxu1 %v1377_v36 }
 0x149   :  { %844 = vmatmul.mubr.bf16.vlgmr.msra.gmra.mxu0 %v423_v38 }
 0x14b   :  { %988 = vmatmul.mubr.bf16.vlgmr.msra.gmra.mxu1 %v424_v39 }
 0x1e9   :  { %v557_v46 = vpop.f32.mrf.mxu0 }
 0x1ea   :  { %v1018_v47 = vadd.f32 %v1011_v43, %v557_v46 }
 0x1eb   :  { %v559_v50 = vpop.f32.mrf.mxu0  ;;  %v701_v51 = vpop.f32.mrf.mxu1 }
 0x1ec   :  { %v1025_v52 = vmul.f32 %v1023_v41, %v1018_v47  ;;  %v1019_v53 = vadd.f32 %v1015_v44, %v559_v50  ;;  %v1044_v54 = vadd.f32 %v1037_v45, %v701_v51 }
 0x1ed   :  { %v561_v55 = vpop.f32.mrf.mxu0  ;;  %v703_v56 = vpop.f32.mrf.mxu1 }
 0x1ee   :  { %1027 = vst [vmem:[#allocation9] sm:$0xff] %v1025_v52  ;;  %v1026_v57 = vmul.f32 %v1023_v41, %v1019_v53  ;;  %v1050_v58 = vmul.f32 %v1048_v48, %v1044_v54  ;;  %v1045_v59 = vadd.f32 %v1041_v49, %v703_v56 }
 0x1ef   :  { %v562_v60 = vpop.f32.mrf.mxu0  ;;  %v705_v61 = vpop.f32.mrf.mxu1 }
 0x1f0   :  { %1028 = vst [vmem:[#allocation9 + $0x8] sm:$0xff] %v1026_v57  ;;  %1052 = vst [vmem:[#allocation9 + $0x10] sm:$0xff] %v1050_v58  ;;  %v1051_v62 = vmul.f32 %v1048_v48, %v1045_v59 }
 0x1f1   :  { %v706_v63 = vpop.f32.mrf.mxu1 }
 0x1f2   :  { %1053 = vst [vmem:[#allocation9 + $0x18] sm:$0xff] %v1051_v62 }
 0x209   :  { %v845_v7 = vpop.f32.mrf.mxu0 }
 0x20a   :  { %v1069_v8 = vadd.f32 %v1062_v4, %v845_v7 }
 0x20b   :  { %v847_v12 = vpop.f32.mrf.mxu0  ;;  %v989_v14 = vpop.f32.mrf.mxu1 }
 0x20c   :  { %v1075_v15 = vmul.f32 %v1073_v2, %v1069_v8  ;;  %v1070_v0 = vadd.f32 %v1066_v5, %v847_v12  ;;  %v1094_v16 = vadd.f32 %v1087_v6, %v989_v14 }
 0x20d   :  { %v849_v17 = vpop.f32.mrf.mxu0  ;;  %v991_v18 = vpop.f32.mrf.mxu1 }
 0x20e   :  { %1077 = vst [vmem:[#allocation9 + $0x20] sm:$0xff] %v1075_v15  ;;  %v1076_v19 = vmul.f32 %v1073_v2, %v1070_v0  ;;  %v1100_v20 = vmul.f32 %v1098_v9, %v1094_v16  ;;  %v1095_v21 = vadd.f32 %v1091_v10, %v991_v18 }
 0x20f   :  { %v850_v22 = vpop.f32.mrf.mxu0  ;;  %v993_v11 = vpop.f32.mrf.mxu1 }
 0x210   :  { %1078 = vst [vmem:[#allocation9 + $0x28] sm:$0xff] %v1076_v19  ;;  %1102 = vst [vmem:[#allocation9 + $0x30] sm:$0xff] %v1100_v20  ;;  %v1101_v23 = vmul.f32 %v1098_v9, %v1095_v21 }
 0x211   :  { %v994_v13 = vpop.f32.mrf.mxu1 }
 0x212   :  { %1103 = vst [vmem:[#allocation9 + $0x38] sm:$0xff] %v1101_v23 }
 0x213   :  { %1459 = shalt.err (!%p1456_p5)
}
 0x214   :  { %1113 = dma.vmem_to_hbm [thread:$0]  %s1111_s4, 1024, %s1592_s6, [#allocation5]  }
 0x215   :  { %1472 = dma.done.wait [#allocation5], 1024  }
 0x216   :  { %1473 = vsyncadd [#allocation5], 4294966272 }
 0x217   :  { %1117 = vsyncpa [#allocation4], 1 }
 0x218   :  { %1118 = vsyncpa [#allocation7], 1 }
 0x219   :  { %1119 = vsyncpa [#allocation5], 1 }

</bundles_post_ra>
